<compile_context>
chip_gen: v5e
topology: v5e:2x2
jax: 0.10.0
libtpu: 0.0.40
codegen_flags: <defaults>
</compile_context>

<pallas_src>
import functools

import jax
import jax.numpy as jnp
from jax.experimental import pallas as pl
from jax.experimental.pallas import tpu as pltpu

_LANE = 128
_COLS_CANDIDATES = (2048, 1024, 512, 256, 128)


def _scale_kernel(x_ref, o_ref, *, scale, compute_dtype):
    # Pure VPU elementwise multiply; math in compute_dtype (f32 for all float
    # inputs -> torch-style fp32 opmath), single rounding on store.
    x = x_ref[...].astype(compute_dtype)
    o_ref[...] = (x * jnp.asarray(scale, dtype=compute_dtype)).astype(o_ref.dtype)


def _round_up(a, b):
    return ((a + b - 1) // b) * b


def _row_align(dtype):
    # Second-to-last block dim alignment by element width (sublane packing).
    itemsize = jnp.dtype(dtype).itemsize
    return {4: 8, 2: 16, 1: 32}.get(itemsize, 8)


def _chip_config():
    """(target_block_bytes_per_buffer, num_tensorcores) for the local chip."""
    try:
        kind = jax.devices()[0].device_kind.lower()
    except Exception:  # pragma: no cover - be robust on exotic setups
        kind = ""
    if "v7" in kind or "7x" in kind:
        # v7x: 3.2 TB/s per TC -> bigger blocks amortize the ~0.35us step
        # overhead; 2 TCs -> prefer an even number of grid steps.
        return 4 * 1024 * 1024, 2
    if "v6" in kind:
        # v6e: 4 MiB blocks (16 MiB double-buffered) fit the 32 MiB scoped VMEM.
        return 4 * 1024 * 1024, 1
    # v5e / unknown: 16 MiB scoped-VMEM default -> stay at 2 MiB per buffer.
    return 2 * 1024 * 1024, 1


def _run_scaled_2d(x2d, scale, out_dtype, compute_dtype, target_block_bytes, num_tc):
    """x2d * scale via Pallas.  x2d is (rows, cols), cols a multiple of 128."""
    rows, cols = x2d.shape
    in_item = jnp.dtype(x2d.dtype).itemsize
    out_item = jnp.dtype(out_dtype).itemsize
    # Row alignment must satisfy both the input and output sublane packing.
    align = max(_row_align(x2d.dtype), _row_align(out_dtype))

    # As many rows per block as ~target_block_bytes allows (multiple of align).
    per_row_bytes = cols * max(in_item, out_item)
    bytes_rows = max(align, (target_block_bytes // per_row_bytes) // align * align)
    tile_rows = min(rows, bytes_rows)          # == rows (full dim) or mult. of align
    steps = pl.cdiv(rows, tile_rows)

    # Dual-TC chips (v7x): force an even (>=2) step count so the "parallel"
    # axis splits evenly across both TensorCores.  Single-TC chips keep a
    # single step for small arrays (no extra pipeline overhead).
    if num_tc > 1 and rows >= num_tc * align:
        even_steps = max(num_tc, _round_up(steps, num_tc))
        tile_rows = min(rows, _round_up(pl.cdiv(rows, even_steps), align))
        steps = pl.cdiv(rows, tile_rows)

    grid = (steps,)
    kernel = functools.partial(_scale_kernel, scale=scale, compute_dtype=compute_dtype)
    return pl.pallas_call(
        kernel,
        out_shape=jax.ShapeDtypeStruct((rows, cols), out_dtype),
        grid_spec=pltpu.PrefetchScalarGridSpec(
            num_scalar_prefetch=0,
            grid=grid,
            in_specs=[pl.BlockSpec((tile_rows, cols), lambda i: (i, 0))],
            out_specs=pl.BlockSpec((tile_rows, cols), lambda i: (i, 0)),
        ),
        compiler_params=pltpu.CompilerParams(
            # "parallel" shards the row axis across TensorCores on v7x.
            dimension_semantics=("parallel",)
        ),
        cost_estimate=pl.CostEstimate(
            flops=rows * cols,
            transcendentals=0,
            bytes_accessed=rows * cols * (in_item + out_item),
        ),
    )(x2d)


def factor_by_constant(x, scale):
    """Computes x * scale with a Pallas TPU kernel (torch FactorByConstant)."""
    orig_shape = x.shape
    dtype = x.dtype
    n = x.size

    # torch-style promotion: int/bool tensor * python-float scale -> float32.
    if isinstance(scale, float) and not jnp.issubdtype(dtype, jnp.floating):
        out_dtype = jnp.float32
    else:
        out_dtype = dtype
    compute_dtype = (jnp.float32
                     if jnp.issubdtype(jnp.dtype(out_dtype), jnp.floating)
                     else out_dtype)

    if n == 0:
        return jnp.zeros(orig_shape, dtype=out_dtype)

    target_block_bytes, num_tc = _chip_config()

    flat = x.reshape(-1)                 # free for contiguous row-major inputs
    m = (n // _LANE) * _LANE             # 128-aligned bulk (== n for ML shapes)
    if m == 0:
        # Tiny (<128-element) tensor: a kernel launch costs more than the math.
        tiny = flat.astype(compute_dtype) * jnp.asarray(scale, dtype=compute_dtype)
        return tiny.astype(out_dtype).reshape(orig_shape)

    # Largest lane width dividing the bulk -> lane-dense, fully contiguous DMAs.
    cols = next(c for c in _COLS_CANDIDATES if m % c == 0)
    bulk = flat[:m].reshape(m // cols, cols)   # pure view when m == n
    out_bulk = _run_scaled_2d(
        bulk, scale, out_dtype, compute_dtype, target_block_bytes, num_tc
    ).reshape(-1)

    if m == n:
        out_flat = out_bulk
    else:
        # Unaligned remainder (< 128 elements): plain XLA multiply + one
        # concatenate; cheaper than the old pad-before + slice-after path.
        tail = flat[m:].astype(compute_dtype) * jnp.asarray(scale, dtype=compute_dtype)
        out_flat = jnp.concatenate([out_bulk, tail.astype(out_dtype)])
    return out_flat.reshape(orig_shape)


if __name__ == "__main__":
    # The module's only state is a python scalar set at init time.
    scale = 2.5

    key = jax.random.PRNGKey(0)
    k1, k2, k3, k4 = jax.random.split(key, 4)

    # Primary shape implied by the module's forward (any tensor works).
    x = jax.random.normal(k1, (2, 4, 16, 16), dtype=jnp.float32)
    y = factor_by_constant(x, scale)
    jax.block_until_ready(y)
    assert y.shape == x.shape and y.dtype == x.dtype
    assert jnp.allclose(y, x * scale, atol=1e-6), "mismatch vs reference (small)"

    # Aligned, multi-step "parallel" grid path.
    x2 = jax.random.normal(k2, (512, 512), dtype=jnp.float32)
    y2 = factor_by_constant(x2, scale)
    jax.block_until_ready(y2)
    assert jnp.allclose(y2, x2 * scale, atol=1e-6), "mismatch vs reference (large)"

    # Unaligned total size -> bulk kernel + XLA tail (no pad/slice round trip).
    x3 = jax.random.normal(k3, (7, 33), dtype=jnp.float32)
    y3 = factor_by_constant(x3, scale)
    jax.block_until_ready(y3)
    assert jnp.allclose(y3, x3 * scale, atol=1e-6), "mismatch vs reference (tail)"

    # bf16 input: fp32 opmath inside the kernel, single rounding on store.
    x4 = jax.random.normal(k4, (64, 256), dtype=jnp.bfloat16)
    y4 = factor_by_constant(x4, scale)
    jax.block_until_ready(y4)
    ref4 = (x4.astype(jnp.float32) * scale).astype(jnp.bfloat16)
    assert y4.dtype == jnp.bfloat16
    assert jnp.allclose(y4.astype(jnp.float32), ref4.astype(jnp.float32),
                        rtol=2e-2, atol=2e-2), "mismatch vs reference (bf16)"

    print("KERNEL_OK")
</pallas_src>

<mosaic_0001>
module attributes {stable_mosaic.version = 11 : i64} {
  func.func @_scale_kernel(%arg0: i32, %arg1: memref<1x2048xf32, #tpu.memory_space<vmem>>, %arg2: memref<1x2048xf32, #tpu.memory_space<vmem>>) attributes {dimension_semantics = [#tpu.dimension_semantics<parallel>], iteration_bounds = array<i64: 1>, scalar_prefetch = 0 : i64, scratch_operands = 0 : i64, tpu.core_type = #tpu.core_type<tc>, window_params = [{transform_indices = @transform_0, window_bounds = array<i64: 1, 2048>}, {transform_indices = @transform_1, window_bounds = array<i64: 1, 2048>}]} {
    %c0 = arith.constant 0 : index
    %c0_0 = arith.constant 0 : index
    %0 = vector.load %arg1[%c0, %c0_0] : memref<1x2048xf32, #tpu.memory_space<vmem>>, vector<1x2048xf32>
    %cst = arith.constant 2.500000e+00 : f32
    %1 = vector.broadcast %cst : f32 to vector<1x2048xf32>
    %2 = arith.mulf %0, %1 : vector<1x2048xf32>
    %c0_1 = arith.constant 0 : index
    %c0_2 = arith.constant 0 : index
    %3 = vector.load %arg2[%c0_1, %c0_2] : memref<1x2048xf32, #tpu.memory_space<vmem>>, vector<1x2048xf32>
    tpu.vector_store %arg2[%c0_1, %c0_2], %2 {strides = array<i32>} : memref<1x2048xf32, #tpu.memory_space<vmem>>, vector<1x2048xf32>,
    return
  }
  func.func @transform_0(%arg0: i32) -> (i32, i32) {
    %c0_i32 = arith.constant 0 : i32
    %c0_i32_0 = arith.constant 0 : i32
    return %arg0, %c0_i32 : i32, i32
  }
  func.func @transform_1(%arg0: i32) -> (i32, i32) {
    %c0_i32 = arith.constant 0 : i32
    %c0_i32_0 = arith.constant 0 : i32
    return %arg0, %c0_i32 : i32, i32
  }
}

</mosaic_0001>

<bundles_post_ra>
// kernel: tpu_custom_call.1
= control target key start
LH: loop header
LB: loop body
LE: loop exit
PB: predicated region body
PF: predicated region fallthrough
CT: control target
= control target key end

     0   :  { %6 = vsyncpa [#allocation3], 0  ;;  %s118_s0 = inlined_call_operand.hbm [shape: f32[1,2048], index: 0, kind: input, shape index: {}]   ;;  %s119_s1 = inlined_call_operand.hbm [shape: f32[1,2048], index: 1, kind: output, shape index: {}]  }
   0x1   :  { %7 = vsyncpa [#allocation4], 0  ;;  %s13_s8 = sshll.u32 %s118_s0, 4  ;;  %s100_s9 = smov [#allocation2]   ;;  %s14_s8 = int_to_ptr.hbm [resolvable:$true] %s13_s8 }
   0x2   :  { %s15_s10 = sshll.u32 %s100_s9, 4  ;;  %s16_s10 = int_to_ptr.vmem [resolvable:$true] %s15_s10 }
   0x3   :  { %18 = dma.hbm_to_vmem [thread:$0]  %s14_s8, 256, %s16_s10, [#allocation3]  }
   0x4   :  { %96 = dma.done.wait [#allocation3], 256  }
   0x5   :  { %97 = vsyncadd [#allocation3], 4294967040  ;;  %s101_s11 = smov [#allocation5]   ;;  %s36_s15 = sshll.u32 %s119_s1, 4  ;;  %v23_v0 = vld [vmem:[#allocation2] sm:$0xff]  ;;  %v24_v1 = vld [vmem:[#allocation2 + $0x8] sm:$0xff]  ;;  %s37_s15 = int_to_ptr.hbm [resolvable:$true] %s36_s15 }
   0x6   :  { %s34_s12 = sshll.u32 %s101_s11, 4  ;;  %v25_v2 = vmul.f32 2.5, %v23_v0  ;;  %v26_v3 = vmul.f32 2.5, %v24_v1  ;;  %s35_s12 = int_to_ptr.vmem [resolvable:$true] %s34_s12 }
   0x8   :  { %27 = vst [vmem:[#allocation5] sm:$0xff] %v25_v2 }
   0x9   :  { %28 = vst [vmem:[#allocation5 + $0x8] sm:$0xff] %v26_v3 }
   0xa   :  { %39 = dma.vmem_to_hbm [thread:$0]  %s35_s12, 256, %s37_s15, [#allocation4]  }
   0xb   :  { %98 = dma.done.wait [#allocation4], 256  }
   0xc   :  { %99 = vsyncadd [#allocation4], 4294967040 }
   0xd   :  { %44 = vsyncpa [#allocation3], 1 }
   0xe   :  { %45 = vsyncpa [#allocation4], 1 }

</bundles_post_ra>
